<compile_context>
chip_gen: v7x
topology: tpu7x:2x2x1
jax: 0.10.0
libtpu: 0.0.40
codegen_flags: <defaults>
</compile_context>

<pallas_src>
import functools

import jax
import jax.numpy as jnp
from jax import lax
from jax.experimental import pallas as pl
from jax.experimental.pallas import tpu as pltpu


def mlp_kernel(x_ref, w1_ref, b1_ref, w2_ref, b2_ref, w3_ref, b3_ref, o_ref,
               *, chunk):
    """One batch tile. x_ref: (tb, IN). o_ref: (1, tb) lane-dense slab."""
    n_chunks = x_ref.shape[0] // chunk

    def body(c, carry):
        r0 = pl.multiple_of(c * chunk, chunk)            # chunk is a multiple of 128
        x = x_ref[pl.ds(r0, chunk), :]                   # (chunk, IN) f32

        # ---- fc1 (MXU, f32 operands, f32 accumulate) ----
        h1 = jnp.dot(x, w1_ref[...], preferred_element_type=jnp.float32)   # (chunk, 64)
        h1 = jnp.maximum(h1 + b1_ref[...], 0.0)
        # TODO(synk): nn.Dropout(p=0.5) is identity in eval(); training-mode
        # dropout (pltpu.prng_random_bits mask + 2x rescale) not implemented.

        # ---- fc2 (MXU) ----
        h2 = jnp.dot(h1, w2_ref[...], preferred_element_type=jnp.float32)  # (chunk, 32)
        h2 = jnp.maximum(h2 + b2_ref[...], 0.0)

        # ---- fc3 (N=1): keep it off the MXU ----
        # Per-chunk XLU transpose -> scalar-per-row lands along lanes, then a
        # VPU multiply by the w3 column and a sublane reduction -> (1, chunk).
        h2t = h2.T                                                          # (32, chunk)
        out = jnp.sum(h2t * w3_ref[...], axis=0, keepdims=True) + b3_ref[...]
        o_ref[:, pl.ds(r0, chunk)] = out.astype(o_ref.dtype)
        return carry

    lax.fori_loop(0, n_chunks, body, None, unroll=True)


def _round_up(v, m):
    return ((v + m - 1) // m) * m


def price_prediction_nn(x, params, *, block_batch=4096):
    """Eval-mode forward. x: (B, input_dim) float32. Returns (B, 1) float32."""
    w1 = params["w1"]   # (IN, 64) f32
    b1 = params["b1"]   # (1, 64)  f32
    w2 = params["w2"]   # (64, 32) f32
    b2 = params["b2"]   # (1, 32)  f32
    w3 = params["w3"]   # (32, 1)  f32 (used on VPU)
    b3 = params["b3"]   # (1, 1)   f32

    B, IN = x.shape

    # ---- batch tile selection -------------------------------------------
    b128 = _round_up(B, 128)
    tb = max(128, min(int(block_batch), b128))
    tb = (tb // 128) * 128
    # Keep at least 2 grid steps when the batch allows it, so the "parallel"
    # batch axis can actually shard across the two TensorCores on v7x.
    if b128 >= 256 and pl.cdiv(b128, tb) < 2:
        tb = max(128, ((b128 // 2) // 128) * 128)
    # Inner sub-chunk loop needs tb % chunk == 0; keep tb a 512-multiple when large.
    if tb > 512:
        tb = (tb // 512) * 512
    chunk = min(512, tb)

    Bp = pl.cdiv(B, tb) * tb
    if Bp != B:
        x = jnp.pad(x, ((0, Bp - B), (0, 0)))
    G = Bp // tb

    def const_spec(shape):
        # Whole array resident in VMEM; same block every step -> no re-DMA.
        return pl.BlockSpec(shape, lambda i: tuple(0 for _ in shape))

    # Advisory cost estimate (lets XLA schedule neighbors around the call).
    flops = 2 * Bp * (IN * 64 + 64 * 32 + 32) + Bp * (64 + 32 + 1)
    weight_bytes = 4 * (IN * 64 + 64 + 64 * 32 + 32 + 32 + 1)
    cost = pl.CostEstimate(
        flops=flops,
        transcendentals=0,
        bytes_accessed=Bp * IN * 4 + Bp * 4 + weight_bytes,
    )

    out = pl.pallas_call(
        functools.partial(mlp_kernel, chunk=chunk),
        out_shape=jax.ShapeDtypeStruct((1, Bp), jnp.float32),
        grid=(G,),
        in_specs=[
            pl.BlockSpec((tb, IN), lambda i: (i, 0)),   # x: tiled along batch
            const_spec(w1.shape), const_spec(b1.shape),
            const_spec(w2.shape), const_spec(b2.shape),
            const_spec(w3.shape), const_spec(b3.shape),
        ],
        # Lane-dense output slab: block (1, tb), tb always a multiple of 128.
        out_specs=pl.BlockSpec((1, tb), lambda i: (0, i)),
        compiler_params=pltpu.CompilerParams(
            dimension_semantics=("parallel",),   # batch tiles independent
            vmem_limit_bytes=16 << 20,
        ),
        cost_estimate=cost,
    )(x, w1, b1, w2, b2, w3, b3)

    # (1, Bp) lane-dense slab -> (B, 1) column matching nn.Linear output.
    return out.reshape(Bp, 1)[:B]


def init_params(key, input_dim):
    """Deterministic init mimicking nn.Linear's U(-1/sqrt(fan_in), 1/sqrt(fan_in))."""
    ks = jax.random.split(key, 6)

    def linear(kw, kb, fan_in, fan_out):
        bound = 1.0 / jnp.sqrt(jnp.float32(fan_in))
        w = jax.random.uniform(kw, (fan_in, fan_out), jnp.float32, -bound, bound)
        b = jax.random.uniform(kb, (1, fan_out), jnp.float32, -bound, bound)
        return w, b

    w1, b1 = linear(ks[0], ks[1], input_dim, 64)
    w2, b2 = linear(ks[2], ks[3], 64, 32)
    w3, b3 = linear(ks[4], ks[5], 32, 1)
    return {"w1": w1, "b1": b1, "w2": w2, "b2": b2, "w3": w3, "b3": b3}


def reference(x, p):
    h1 = jnp.maximum(x @ p["w1"] + p["b1"], 0.0)
    h2 = jnp.maximum(h1 @ p["w2"] + p["b2"], 0.0)
    return h2 @ p["w3"] + p["b3"]


if __name__ == "__main__":
    key = jax.random.PRNGKey(0)
    k_x, k_p = jax.random.split(key)

    batch, input_dim = 8, 16
    x = jax.random.normal(k_x, (batch, input_dim), jnp.float32)
    params = init_params(k_p, input_dim)

    out = jax.block_until_ready(price_prediction_nn(x, params))
    ref = reference(x, params)

    assert out.shape == (batch, 1)
    # f32 operands throughout; tolerance covers MXU default-precision rounding.
    assert jnp.allclose(out, ref, atol=2e-2, rtol=2e-2), "mismatch vs reference"

    print("KERNEL_OK")
</pallas_src>

<mosaic_0001>
module attributes {stable_mosaic.version = 11 : i64} {
  func.func @mlp_kernel(%arg0: i32, %arg1: memref<128x16xf32, #tpu.memory_space<vmem>>, %arg2: memref<16x64xf32, #tpu.memory_space<vmem>>, %arg3: memref<1x64xf32, #tpu.memory_space<vmem>>, %arg4: memref<64x32xf32, #tpu.memory_space<vmem>>, %arg5: memref<1x32xf32, #tpu.memory_space<vmem>>, %arg6: memref<32x1xf32, #tpu.memory_space<vmem>>, %arg7: memref<1x1xf32, #tpu.memory_space<vmem>>, %arg8: memref<1x128xf32, #tpu.memory_space<vmem>>) attributes {dimension_semantics = [#tpu.dimension_semantics<parallel>], iteration_bounds = array<i64: 1>, scalar_prefetch = 0 : i64, scratch_operands = 0 : i64, tpu.core_type = #tpu.core_type<tc>, window_params = [{transform_indices = @transform_0, window_bounds = array<i64: 128, 16>}, {pipeline_mode = #tpu.pipeline_mode<synchronous>, transform_indices = @transform_1, window_bounds = array<i64: 16, 64>}, {pipeline_mode = #tpu.pipeline_mode<synchronous>, transform_indices = @transform_2, window_bounds = array<i64: 1, 64>}, {pipeline_mode = #tpu.pipeline_mode<synchronous>, transform_indices = @transform_3, window_bounds = array<i64: 64, 32>}, {pipeline_mode = #tpu.pipeline_mode<synchronous>, transform_indices = @transform_4, window_bounds = array<i64: 1, 32>}, {pipeline_mode = #tpu.pipeline_mode<synchronous>, transform_indices = @transform_5, window_bounds = array<i64: 32, 1>}, {pipeline_mode = #tpu.pipeline_mode<synchronous>, transform_indices = @transform_6, window_bounds = array<i64: 1, 1>}, {transform_indices = @transform_7, window_bounds = array<i64: 1, 128>}]} {
    %c0_i32 = arith.constant 0 : i32
    %c128_i32 = arith.constant 128 : i32
    %0 = arith.muli %c0_i32, %c128_i32 : i32
    %1 = tpu.assume_multiple %0, 128 : i32
    %2 = arith.index_cast %1 : i32 to index
    %c0 = arith.constant 0 : index
    %3 = vector.load %arg1[%2, %c0] : memref<128x16xf32, #tpu.memory_space<vmem>>, vector<128x16xf32>
    %c0_0 = arith.constant 0 : index
    %c0_1 = arith.constant 0 : index
    %4 = vector.load %arg2[%c0_0, %c0_1] : memref<16x64xf32, #tpu.memory_space<vmem>>, vector<16x64xf32>
    %cst = arith.constant dense<0.000000e+00> : vector<128x64xf32>
    %5 = tpu.matmul %3, %4, %cst {dimension_numbers = #tpu.dot_dimension_numbers<[1], [0], [0], [1], [0, 0, 1, 1], [], []>} : vector<128x16xf32>, vector<16x64xf32>, vector<128x64xf32> -> vector<128x64xf32>
    %c0_2 = arith.constant 0 : index
    %c0_3 = arith.constant 0 : index
    %6 = vector.load %arg3[%c0_2, %c0_3] : memref<1x64xf32, #tpu.memory_space<vmem>>, vector<1x64xf32>
    %7 = vector.broadcast %6 : vector<1x64xf32> to vector<128x64xf32>
    %8 = arith.addf %5, %7 : vector<128x64xf32>
    %cst_4 = arith.constant 0.000000e+00 : f32
    %9 = vector.broadcast %cst_4 : f32 to vector<128x64xf32>
    %10 = arith.maximumf %8, %9 : vector<128x64xf32>
    %c0_5 = arith.constant 0 : index
    %c0_6 = arith.constant 0 : index
    %11 = vector.load %arg4[%c0_5, %c0_6] : memref<64x32xf32, #tpu.memory_space<vmem>>, vector<64x32xf32>
    %cst_7 = arith.constant dense<0.000000e+00> : vector<128x32xf32>
    %12 = tpu.matmul %10, %11, %cst_7 {dimension_numbers = #tpu.dot_dimension_numbers<[1], [0], [0], [1], [0, 0, 1, 1], [], []>} : vector<128x64xf32>, vector<64x32xf32>, vector<128x32xf32> -> vector<128x32xf32>
    %c0_8 = arith.constant 0 : index
    %c0_9 = arith.constant 0 : index
    %13 = vector.load %arg5[%c0_8, %c0_9] : memref<1x32xf32, #tpu.memory_space<vmem>>, vector<1x32xf32>
    %14 = vector.broadcast %13 : vector<1x32xf32> to vector<128x32xf32>
    %15 = arith.addf %12, %14 : vector<128x32xf32>
    %cst_10 = arith.constant 0.000000e+00 : f32
    %16 = vector.broadcast %cst_10 : f32 to vector<128x32xf32>
    %17 = arith.maximumf %15, %16 : vector<128x32xf32>
    %18 = tpu.transpose %17, [1, 0] : vector<128x32xf32> -> vector<32x128xf32>
    %c0_11 = arith.constant 0 : index
    %c0_12 = arith.constant 0 : index
    %19 = vector.load %arg6[%c0_11, %c0_12] : memref<32x1xf32, #tpu.memory_space<vmem>>, vector<32x1xf32>
    %20 = vector.broadcast %19 : vector<32x1xf32> to vector<32x128xf32>
    %21 = arith.mulf %18, %20 : vector<32x128xf32>
    %cst_13 = arith.constant dense<0.000000e+00> : vector<128xf32>
    %22 = vector.multi_reduction <add>, %21, %cst_13 [0] : vector<32x128xf32> to vector<128xf32>
    %23 = vector.shape_cast %22 : vector<128xf32> to vector<1x128xf32>
    %c0_14 = arith.constant 0 : index
    %c0_15 = arith.constant 0 : index
    %24 = vector.load %arg7[%c0_14, %c0_15] : memref<1x1xf32, #tpu.memory_space<vmem>>, vector<1x1xf32>
    %25 = vector.broadcast %24 : vector<1x1xf32> to vector<1x128xf32>
    %26 = arith.addf %23, %25 : vector<1x128xf32>
    %c0_16 = arith.constant 0 : index
    %27 = arith.index_cast %1 : i32 to index
    %28 = vector.load %arg8[%c0_16, %27] : memref<1x128xf32, #tpu.memory_space<vmem>>, vector<1x128xf32>
    tpu.vector_store %arg8[%c0_16, %27], %26 {strides = array<i32>} : memref<1x128xf32, #tpu.memory_space<vmem>>, vector<1x128xf32>,
    %c1_i32 = arith.constant 1 : i32
    return
  }
  func.func @transform_0(%arg0: i32) -> (i32, i32) {
    %c0_i32 = arith.constant 0 : i32
    %c0_i32_0 = arith.constant 0 : i32
    return %arg0, %c0_i32 : i32, i32
  }
  func.func @transform_1(%arg0: i32) -> (i32, i32) {
    %c0_i32 = arith.constant 0 : i32
    %c0_i32_0 = arith.constant 0 : i32
    %c0_i32_1 = arith.constant 0 : i32
    return %c0_i32, %c0_i32_0 : i32, i32
  }
  func.func @transform_2(%arg0: i32) -> (i32, i32) {
    %c0_i32 = arith.constant 0 : i32
    %c0_i32_0 = arith.constant 0 : i32
    %c0_i32_1 = arith.constant 0 : i32
    return %c0_i32, %c0_i32_0 : i32, i32
  }
  func.func @transform_3(%arg0: i32) -> (i32, i32) {
    %c0_i32 = arith.constant 0 : i32
    %c0_i32_0 = arith.constant 0 : i32
    %c0_i32_1 = arith.constant 0 : i32
    return %c0_i32, %c0_i32_0 : i32, i32
  }
  func.func @transform_4(%arg0: i32) -> (i32, i32) {
    %c0_i32 = arith.constant 0 : i32
    %c0_i32_0 = arith.constant 0 : i32
    %c0_i32_1 = arith.constant 0 : i32
    return %c0_i32, %c0_i32_0 : i32, i32
  }
  func.func @transform_5(%arg0: i32) -> (i32, i32) {
    %c0_i32 = arith.constant 0 : i32
    %c0_i32_0 = arith.constant 0 : i32
    %c0_i32_1 = arith.constant 0 : i32
    return %c0_i32, %c0_i32_0 : i32, i32
  }
  func.func @transform_6(%arg0: i32) -> (i32, i32) {
    %c0_i32 = arith.constant 0 : i32
    %c0_i32_0 = arith.constant 0 : i32
    %c0_i32_1 = arith.constant 0 : i32
    return %c0_i32, %c0_i32_0 : i32, i32
  }
  func.func @transform_7(%arg0: i32) -> (i32, i32) {
    %c0_i32 = arith.constant 0 : i32
    %c0_i32_0 = arith.constant 0 : i32
    return %c0_i32, %arg0 : i32, i32
  }
}

</mosaic_0001>

<bundles_post_ra>
// kernel: tpu_custom_call.1
= control target key start
LH: loop header
LB: loop body
LE: loop exit
PB: predicated region body
PF: predicated region fallthrough
CT: control target
= control target key end

     0   :  { %s969_s0 = inlined_call_operand.vmem [shape: f32[128,16], index: 0, kind: input, shape index: {}]   ;;  %s970_s1 = inlined_call_operand.vmem [shape: f32[16,64], index: 1, kind: input, shape index: {}]   ;;  %s971_s2 = inlined_call_operand.vmem [shape: f32[1,64], index: 2, kind: input, shape index: {}]   ;;  %s972_s3 = inlined_call_operand.vmem [shape: f32[64,32], index: 3, kind: input, shape index: {}]   ;;  %s973_s4 = inlined_call_operand.vmem [shape: f32[1,32], index: 4, kind: input, shape index: {}]   ;;  %s974_s5 = inlined_call_operand.vmem [shape: f32[32,1], index: 5, kind: input, shape index: {}]   ;;  %s975_s6 = inlined_call_operand.<no memory space> [shape: f32[1,1], index: 6, kind: input, shape index: {}]   ;;  %s976_s7 = inlined_call_operand.hbm [shape: f32[1,128], index: 7, kind: output, shape index: {}]  }
   0x1   :  { %v12_v0 = vstv %s975_s6 }
   0x2   :  { %13 = vst [vmem:[#allocation2] sm:$0x1] %v12_v0 }
   0x3   :  { %v45_v1 = vld [vmem:[%s970_s1] sm:$0xff]  ;;  %v46_v2 = vld [vmem:[%s970_s1 + $0x8] sm:$0xff]  ;;  %vm54_vm0 = vcmask 130048   ;;  %v31_v6 = vld [vmem:[%s969_s0 + $0x10] sm:$0xff] }
   0x4   :  { %v29_v3 = vld [vmem:[%s969_s0] sm:$0xff]  ;;  %v728_v4 = vpack.c.bf16 %v46_v2, %v45_v1  ;;  %v30_v5 = vld [vmem:[%s969_s0 + $0x8] sm:$0xff]  ;;  %v266_v9 = vld [vmem:[%s972_s3 + $0x10] sm:$0xff] }
   0x5   :  { %664 = vmatprep.mubr.msk.f32.mxu0 %vm54_vm0, %v29_v3  ;;  %v264_v7 = vld [vmem:[%s972_s3] sm:$0xff]  ;;  %v265_v8 = vld [vmem:[%s972_s3 + $0x8] sm:$0xff]  ;;  %v32_v10 = vld [vmem:[%s969_s0 + $0x18] sm:$0xff] }
   0x6   :  { %729 = vmatprep.subr.bf16.mxu0 %v728_v4  ;;  %v732_v11 = vpack.c.bf16 %v265_v8, %v264_v7  ;;  %v267_v12 = vld [vmem:[%s972_s3 + $0x18] sm:$0xff]  ;;  %v268_v14 = vld [vmem:[%s972_s3 + $0x20] sm:$0xff]  ;;  %v269_v15 = vld [vmem:[%s972_s3 + $0x28] sm:$0xff] }
   0x7   :  { %731 = vmatpush3.bf16.msra.mxu0 %v728_v4  ;;  %v736_v13 = vpack.c.bf16 %v267_v12, %v266_v9 }
   0xa   :  { %665 = vmatmul.mubr.msk.f32.vlgmr.msra.gmra.mrb[0].mxu0 %vm54_vm0, %v30_v5 }
   0xb   :  { %667 = vmatprep.mubr.msk.f32.mxu0 %vm54_vm0, %v31_v6 }
   0xc   :  { %14 = vsyncpa [#allocation4], 0  ;;  %v33_v16 = vld [vmem:[%s969_s0 + $0x20] sm:$0xff]  ;;  %733 = vmatprep.subr.bf16.mxu0 %v732_v11  ;;  %748 = vmatprep.subr.bf16.mxu1 %v732_v11  ;;  %v740_v17 = vpack.c.bf16 %v269_v15, %v268_v14  ;;  %v34_v18 = vld [vmem:[%s969_s0 + $0x28] sm:$0xff]  ;;  %v784_v33 = vmov 0   ;;  %vm279_vm1 = vcmask 523264  }
   0xd   :  { %735 = vmatpush3.bf16.msra.mxu0 %v732_v11  ;;  %752 = vmatpush3.bf16.msra.mxu1 %v732_v11  ;;  %v270_v19 = vld [vmem:[%s972_s3 + $0x30] sm:$0xff]  ;;  %v271_v20 = vld [vmem:[%s972_s3 + $0x38] sm:$0xff]  ;;  %v37_v24 = vld [vmem:[%s969_s0 + $0x40] sm:$0xff] }
   0xe   :  { %668 = vmatmul.mubr.msk.f32.gmra.mrb[2].mxu0 %vm54_vm0, %v32_v10  ;;  %737 = vmatprep.subr.bf16.mxu0 %v736_v13  ;;  %v35_v21 = vld [vmem:[%s969_s0 + $0x30] sm:$0xff]  ;;  %v744_v22 = vpack.c.bf16 %v271_v20, %v270_v19  ;;  %v36_v23 = vld [vmem:[%s969_s0 + $0x38] sm:$0xff]  ;;  %v38_v25 = vld [vmem:[%s969_s0 + $0x48] sm:$0xff] }
   0xf   :  { %670 = vmatprep.mubr.msk.f32.mxu0 %vm54_vm0, %v33_v16  ;;  %749 = vmatprep.subr.bf16.mxu1 %v736_v13  ;;  %v39_v26 = vld [vmem:[%s969_s0 + $0x50] sm:$0xff]  ;;  %v40_v27 = vld [vmem:[%s969_s0 + $0x58] sm:$0xff]  ;;  %v41_v28 = vld [vmem:[%s969_s0 + $0x60] sm:$0xff] }
  0x10   :  { %v42_v29 = vld [vmem:[%s969_s0 + $0x68] sm:$0xff]  ;;  %v43_v30 = vld [vmem:[%s969_s0 + $0x70] sm:$0xff]  ;;  %v44_v31 = vld [vmem:[%s969_s0 + $0x78] sm:$0xff]  ;;  %759 = vset.pattern.permute.xlu1 %v784_v33  ;;  %758 = vset.pattern.permute.xlu0 %v784_v33 }
  0x11   :  { %739 = vmatpush3.bf16.msra.mxu0 %v736_v13  ;;  %753 = vmatpush3.bf16.msra.mxu1 %v736_v13  ;;  %v523_v32 = vld [vmem:[%s974_s5 + $0x10] sm:$0xff]  ;;  %v524_v34 = vld [vmem:[%s974_s5 + $0x18] sm:$0xff]  ;;  %v584_v35 = vld [vmem:[%s971_s2] ss:$0 sm:$0xff] }
  0x12   :  { %671 = vmatmul.mubr.msk.f32.gmra.mrb[4].mxu0 %vm54_vm0, %v34_v18  ;;  %741 = vmatprep.subr.bf16.mxu0 %v740_v17  ;;  %v521_v20 = vld [vmem:[%s974_s5] sm:$0xff] }
  0x13   :  { %673 = vmatprep.mubr.msk.f32.mxu0 %vm54_vm0, %v35_v21  ;;  %750 = vmatprep.subr.bf16.mxu1 %v740_v17  ;;  %v522_v21 = vld [vmem:[%s974_s5 + $0x8] sm:$0xff] }
  0x14   :  { %537 = vperm.xlu1 %759, %v523_v32   ;;  %527 = vperm.xlu0 %758, %v521_v20  }
  0x15   :  { %743 = vmatpush3.bf16.msra.mxu0 %v740_v17  ;;  %754 = vmatpush3.bf16.msra.mxu1 %v740_v17 }
  0x16   :  { %674 = vmatmul.mubr.msk.f32.gmra.mrb[6].mxu0 %vm54_vm0, %v36_v23  ;;  %745 = vmatprep.subr.bf16.mxu0 %v744_v22  ;;  %v601_v23 = vld [vmem:[%s973_s4] ss:$0 sm:$0xff]  ;;  %s785_s4 = smov [#allocation3]  }
  0x17   :  { %676 = vmatprep.mubr.msk.f32.mxu0 %vm54_vm0, %v37_v24  ;;  %751 = vmatprep.subr.bf16.mxu1 %v744_v22  ;;  %s576_s5 = sshll.u32 %s785_s4, 4  ;;  %s577_s5 = int_to_ptr.vmem [resolvable:$true] %s576_s5 }
  0x18   :  { %542 = vperm.xlu1 %759, %v524_v34   ;;  %532 = vperm.xlu0 %758, %v522_v21   ;;  %s760_s1 = scalar_lea.vmem %s577_s5, 16  ;;  %s764_s3 = scalar_lea.vmem %s577_s5, 32 }
  0x19   :  { %747 = vmatpush3.bf16.msra.mxu0 %v744_v22  ;;  %755 = vmatpush3.bf16.msra.mxu1 %v744_v22  ;;  %v558_v22 = vld [vmem:[#allocation2] sm:$0x1]  ;;  %p761_p0 = scmp.ne.s32.totalorder %s577_s5, %s760_s1  ;;  %p765_p1 = scmp.lt.s32.totalorder %s577_s5, %s577_s5 }
  0x1a   :  { %677 = vmatmul.mubr.msk.f32.gmra.mrb[8].mxu0 %vm54_vm0, %v38_v25  ;;  %p766_p2 = scmp.lt.s32.totalorder %s764_s3, %s760_s1 }
  0x1b   :  { %679 = vmatprep.mubr.msk.f32.mxu0 %vm54_vm0, %v39_v26 }
  0x1c   :  { %561 = vperm.xlu0 %758, %v558_v22   ;;  %v564_v22 = vlaneseq  ;;  %p767_p3 = por %p766_p2, %p765_p1 }
  0x1e   :  { %680 = vmatmul.mubr.msk.f32.gmra.mrb[10].mxu0 %vm54_vm0, %v40_v27  ;;  %p768_p4 = pnand %p767_p3, %p761_p0 }
  0x1f   :  { %682 = vmatprep.mubr.msk.f32.mxu0 %vm54_vm0, %v41_v28 }
  0x22   :  { %683 = vmatmul.mubr.msk.f32.gmra.mrb[12].mxu0 %vm54_vm0, %v42_v29 }
  0x23   :  { %685 = vmatprep.mubr.msk.f32.mxu0 %vm54_vm0, %v43_v30 }
  0x26   :  { %686 = vmatmul.mubr.msk.f32.gmra.mrb[14].mxu0 %vm54_vm0, %v44_v31 }
  0xdd   :  { %v666_v36 = vpop.f32.mrb[0].mxu0 }
  0xde   :  { %v175_v37 = vadd.f32 %v666_v36, %v584_v35  ;;  %v169_v38 = vpop.f32.mrb[1].mxu0 }
  0xdf   :  { %v170_v39 = vadd.f32 %v584_v35, %v169_v38 }
  0xe0   :  { %v249_v42 = vmax.f32 %v175_v37, 0.0 }
  0xe1   :  { %v248_v40 = vmax.f32 %v170_v39, 0.0  ;;  %v669_v41 = vpop.f32.mrb[2].mxu0 }
  0xe2   :  { %v185_v43 = vadd.f32 %v669_v41, %v584_v35  ;;  %v179_v44 = vpop.f32.mrb[3].mxu0 }
  0xe3   :  { %v180_v45 = vadd.f32 %v584_v35, %v179_v44  ;;  %704 = vmatprep.mubr.msk.f32.mxu0 %vm279_vm1, %v248_v40 }
  0xe4   :  { %v251_v46 = vmax.f32 %v185_v43, 0.0  ;;  %705 = vmatmul.mubr.msk.f32.vlgmr.msra.gmra.mrb[16].mxu0 %vm279_vm1, %v249_v42 }
  0xe5   :  { %v250_v47 = vmax.f32 %v180_v45, 0.0  ;;  %v672_v48 = vpop.f32.mrb[4].mxu0 }
  0xe6   :  { %v195_v49 = vadd.f32 %v672_v48, %v584_v35  ;;  %v189_v50 = vpop.f32.mrb[5].mxu0 }
  0xe7   :  { %707 = vmatprep.mubr.msk.f32.mxu1 %vm279_vm1, %v250_v47  ;;  %v190_v51 = vadd.f32 %v584_v35, %v189_v50 }
  0xe8   :  { %708 = vmatmul.mubr.msk.f32.vlgmr.msra.gmra.mrb[0].mxu1 %vm279_vm1, %v251_v46  ;;  %v253_v52 = vmax.f32 %v195_v49, 0.0 }
  0xe9   :  { %v252_v53 = vmax.f32 %v190_v51, 0.0  ;;  %v675_v54 = vpop.f32.mrb[6].mxu0 }
  0xea   :  { %v205_v55 = vadd.f32 %v675_v54, %v584_v35  ;;  %v199_v56 = vpop.f32.mrb[7].mxu0 }
  0xeb   :  { %710 = vmatprep.mubr.msk.f32.mxu1 %vm279_vm1, %v252_v53  ;;  %v200_v57 = vadd.f32 %v584_v35, %v199_v56 }
  0xec   :  { %711 = vmatmul.mubr.msk.f32.gmra.mrb[2].mxu1 %vm279_vm1, %v253_v52  ;;  %v255_v58 = vmax.f32 %v205_v55, 0.0 }
  0xed   :  { %v254_v59 = vmax.f32 %v200_v57, 0.0  ;;  %v678_v60 = vpop.f32.mrb[8].mxu0 }
  0xee   :  { %v215_v61 = vadd.f32 %v678_v60, %v584_v35  ;;  %v209_v62 = vpop.f32.mrb[9].mxu0 }
  0xef   :  { %713 = vmatprep.mubr.msk.f32.mxu1 %vm279_vm1, %v254_v59  ;;  %v210_v63 = vadd.f32 %v584_v35, %v209_v62 }
  0xf0   :  { %714 = vmatmul.mubr.msk.f32.gmra.mrb[4].mxu1 %vm279_vm1, %v255_v58  ;;  %v257_v0 = vmax.f32 %v215_v61, 0.0 }
  0xf1   :  { %v256_v1 = vmax.f32 %v210_v63, 0.0  ;;  %v681_v2 = vpop.f32.mrb[10].mxu0 }
  0xf2   :  { %v225_v3 = vadd.f32 %v681_v2, %v584_v35  ;;  %v219_v4 = vpop.f32.mrb[11].mxu0 }
  0xf3   :  { %716 = vmatprep.mubr.msk.f32.mxu1 %vm279_vm1, %v256_v1  ;;  %v220_v5 = vadd.f32 %v584_v35, %v219_v4 }
  0xf4   :  { %717 = vmatmul.mubr.msk.f32.gmra.mrb[6].mxu1 %vm279_vm1, %v257_v0  ;;  %v259_v6 = vmax.f32 %v225_v3, 0.0 }
  0xf5   :  { %v258_v7 = vmax.f32 %v220_v5, 0.0  ;;  %v684_v8 = vpop.f32.mrb[12].mxu0 }
  0xf6   :  { %v235_v9 = vadd.f32 %v684_v8, %v584_v35  ;;  %v229_v10 = vpop.f32.mrb[13].mxu0  ;;  %v538_v8 = vpop.permute.xlu1 %537 }
  0xf7   :  { %719 = vmatprep.mubr.msk.f32.mxu1 %vm279_vm1, %v258_v7  ;;  %v230_v11 = vadd.f32 %v584_v35, %v229_v10  ;;  %v528_v10 = vpop.permute.xlu0 %527 }
  0xf8   :  { %720 = vmatmul.mubr.msk.f32.gmra.mrb[8].mxu1 %vm279_vm1, %v259_v6  ;;  %v261_v12 = vmax.f32 %v235_v9, 0.0 }
  0xf9   :  { %v260_v13 = vmax.f32 %v230_v11, 0.0  ;;  %v687_v14 = vpop.f32.mrb[14].mxu0 }
  0xfa   :  { %v245_v15 = vadd.f32 %v687_v14, %v584_v35  ;;  %v239_v16 = vpop.f32.mrb[15].mxu0  ;;  %v543_v9 = vpop.permute.xlu1 %542 }
  0xfb   :  { %722 = vmatprep.mubr.msk.f32.mxu1 %vm279_vm1, %v260_v13  ;;  %v240_v17 = vadd.f32 %v584_v35, %v239_v16  ;;  %v533_v13 = vpop.permute.xlu0 %532 }
  0xfc   :  { %723 = vmatmul.mubr.msk.f32.gmra.mrb[10].mxu1 %vm279_vm1, %v261_v12  ;;  %v263_v18 = vmax.f32 %v245_v15, 0.0 }
  0xfd   :  { %v262_v19 = vmax.f32 %v240_v17, 0.0 }
  0xff   :  { %725 = vmatprep.mubr.msk.f32.mxu1 %vm279_vm1, %v262_v19 }
 0x100   :  { %726 = vmatmul.mubr.msk.f32.gmra.mrb[12].mxu1 %vm279_vm1, %v263_v18 }
 0x1b7   :  { %v706_v24 = vpop.f32.mrb[16].mxu0 }
 0x1b8   :  { %v394_v25 = vpop.f32.mrb[17].mxu0  ;;  %v400_v27 = vadd.f32 %v706_v24, %v601_v23 }
 0x1b9   :  { %v395_v26 = vadd.f32 %v601_v23, %v394_v25  ;;  %v565_v25 = vshrl.u32 %v564_v22, 7 }
 0x1ba   :  { %v474_v31 = vmax.f32 %v400_v27, 0.0 }
 0x1bb   :  { %v473_v28 = vmax.f32 %v395_v26, 0.0  ;;  %v709_v29 = vpop.f32.mrb[0].mxu1 }
 0x1bc   :  { %v404_v30 = vpop.f32.mrb[1].mxu1  ;;  %v410_v35 = vadd.f32 %v709_v29, %v601_v23 }
 0x1bd   :  { %489 = vxpose.xlu1.b32.start [1/16] (narrow) %v473_v28, 32  ;;  %v405_v32 = vadd.f32 %v601_v23, %v404_v30  ;;  %v566_v28 = vsub.s32 0, %v565_v25  ;;  %v562_v30 = vpop.permute.xlu0 %561 }
 0x1be   :  { %v476_v39 = vmax.f32 %v410_v35, 0.0 }
 0x1bf   :  { %v712_v33 = vpop.f32.mrb[2].mxu1  ;;  %v475_v36 = vmax.f32 %v405_v32, 0.0  ;;  %v567_v32 = vrot.slane %v562_v30, %v566_v28 }
 0x1c0   :  { %v414_v34 = vpop.f32.mrb[3].mxu1  ;;  %v420_v43 = vadd.f32 %v712_v33, %v601_v23 }
 0x1c1   :  { %490 = vxpose.xlu1.b32.cont [2/16] (narrow) %v474_v31, 32  ;;  %v415_v40 = vadd.f32 %v601_v23, %v414_v34 }
 0x1c2   :  { %v478_v47 = vmax.f32 %v420_v43, 0.0 }
 0x1c3   :  { %v715_v37 = vpop.f32.mrb[4].mxu1  ;;  %v477_v44 = vmax.f32 %v415_v40, 0.0 }
 0x1c4   :  { %v424_v38 = vpop.f32.mrb[5].mxu1  ;;  %v430_v51 = vadd.f32 %v715_v37, %v601_v23 }
 0x1c5   :  { %491 = vxpose.xlu1.b32.cont [3/16] (narrow) %v475_v36, 32  ;;  %v425_v48 = vadd.f32 %v601_v23, %v424_v38 }
 0x1c6   :  { %v480_v55 = vmax.f32 %v430_v51, 0.0 }
 0x1c7   :  { %v718_v41 = vpop.f32.mrb[6].mxu1  ;;  %v479_v52 = vmax.f32 %v425_v48, 0.0 }
 0x1c8   :  { %v434_v42 = vpop.f32.mrb[7].mxu1  ;;  %v440_v57 = vadd.f32 %v718_v41, %v601_v23 }
 0x1c9   :  { %492 = vxpose.xlu1.b32.cont [4/16] (narrow) %v476_v39, 32  ;;  %v435_v56 = vadd.f32 %v601_v23, %v434_v42 }
 0x1ca   :  { %v482_v59 = vmax.f32 %v440_v57, 0.0 }
 0x1cb   :  { %v721_v45 = vpop.f32.mrb[8].mxu1  ;;  %v481_v58 = vmax.f32 %v435_v56, 0.0 }
 0x1cc   :  { %v444_v46 = vpop.f32.mrb[9].mxu1  ;;  %v450_v61 = vadd.f32 %v721_v45, %v601_v23 }
 0x1cd   :  { %493 = vxpose.xlu1.b32.cont [5/16] (narrow) %v477_v44, 32  ;;  %v445_v60 = vadd.f32 %v601_v23, %v444_v46 }
 0x1ce   :  { %v484_v63 = vmax.f32 %v450_v61, 0.0 }
 0x1cf   :  { %v724_v49 = vpop.f32.mrb[10].mxu1  ;;  %v483_v62 = vmax.f32 %v445_v60, 0.0 }
 0x1d0   :  { %v454_v50 = vpop.f32.mrb[11].mxu1  ;;  %v460_v1 = vadd.f32 %v724_v49, %v601_v23 }
 0x1d1   :  { %494 = vxpose.xlu1.b32.cont [6/16] (narrow) %v478_v47, 32  ;;  %v455_v0 = vadd.f32 %v601_v23, %v454_v50 }
 0x1d2   :  { %v486_v3 = vmax.f32 %v460_v1, 0.0 }
 0x1d3   :  { %v727_v53 = vpop.f32.mrb[12].mxu1  ;;  %v485_v2 = vmax.f32 %v455_v0, 0.0 }
 0x1d4   :  { %v464_v54 = vpop.f32.mrb[13].mxu1  ;;  %v470_v5 = vadd.f32 %v727_v53, %v601_v23 }
 0x1d5   :  { %495 = vxpose.xlu1.b32.cont [7/16] (narrow) %v479_v52, 32  ;;  %v465_v4 = vadd.f32 %v601_v23, %v464_v54 }
 0x1d6   :  { %v488_v7 = vmax.f32 %v470_v5, 0.0 }
 0x1d7   :  { %v487_v6 = vmax.f32 %v465_v4, 0.0 }
 0x1d9   :  { %496 = vxpose.xlu1.b32.cont [8/16] (narrow) %v480_v55, 32 }
 0x1dd   :  { %497 = vxpose.xlu1.b32.cont [9/16] (narrow) %v481_v58, 32 }
 0x1e1   :  { %498 = vxpose.xlu1.b32.cont [10/16] (narrow) %v482_v59, 32 }
 0x1e5   :  { %499 = vxpose.xlu1.b32.cont [11/16] (narrow) %v483_v62, 32 }
 0x1e9   :  { %500 = vxpose.xlu1.b32.cont [12/16] (narrow) %v484_v63, 32 }
 0x1ed   :  { %501 = vxpose.xlu1.b32.cont [13/16] (narrow) %v485_v2, 32 }
 0x1f1   :  { %502 = vxpose.xlu1.b32.cont [14/16] (narrow) %v486_v3, 32 }
 0x1f5   :  { %503 = vxpose.xlu1.b32.cont [15/16] (narrow) %v487_v6, 32 }
 0x1f9   :  { %504 = vxpose.xlu1.b32.end [16/16] (narrow) %v488_v7, 32 }
 0x23d   :  { %v505_v11 = vpop.trf.xlu1 }
 0x23e   :  { %v545_v16 = vmul.f32 %v528_v10, %v505_v11 }
 0x241   :  { %v506_v12 = vpop.trf.xlu1 }
 0x242   :  { %v546_v14 = vmul.f32 %v533_v13, %v506_v12 }
 0x244   :  { %v549_v18 = vadd.f32 %v546_v14, %v545_v16 }
 0x245   :  { %v507_v15 = vpop.trf.xlu1 }
 0x246   :  { %v547_v17 = vmul.f32 %v538_v8, %v507_v15 }
 0x248   :  { %v550_v20 = vadd.f32 %v549_v18, %v547_v17 }
 0x249   :  { %v508_v19 = vpop.trf.xlu1 }
 0x24a   :  { %v548_v21 = vmul.f32 %v543_v9, %v508_v19 }
 0x24c   :  { %v551_v23 = vadd.f32 %v550_v20, %v548_v21 }
 0x24e   :  { %v552_v24 = vrot.slane %v551_v23, 4 }
 0x250   :  { %v553_v26 = vadd.f32 %v552_v24, %v551_v23 }
 0x252   :  { %v554_v27 = vrot.slane %v553_v26, 2 }
 0x254   :  { %v555_v29 = vadd.f32 %v554_v27, %v553_v26 }
 0x256   :  { %v556_v31 = vrot.slane %v555_v29, 1 }
 0x258   :  { %v557_v33 = vadd.f32 %v556_v31, %v555_v29 }
 0x25a   :  { %v568_v34 = vadd.f32 %v567_v32, %v557_v33 }
 0x25c   :  { %569 = vst [vmem:[#allocation3] sm:$0x1] %v568_v34 }
 0x25d   :  { %771 = shalt.err (!%p768_p4)
}
 0x25e   :  { %s772_s15 = scalar_lea.hbm %s976_s7, 16 }
 0x25f   :  { %p773_p5 = scmp.ne.s32.totalorder %s976_s7, %s772_s15  ;;  %p776_p6 = scmp.lt.u32.totalorder %s772_s15, %s976_s7 }
 0x261   :  { %p778_p7 = pnand %p776_p6, %p773_p5 }
 0x263   :  { %781 = shalt.err (!%p778_p7)
}
 0x264   :  { %579 = dma.vmem_to_hbm [thread:$0]  %s577_s5, 16, %s976_s7, [#allocation4]  }
 0x265   :  { %782 = dma.done.wait [#allocation4], 16  }
 0x266   :  { %783 = vsyncadd [#allocation4], 4294967280 }
 0x267   :  { %583 = vsyncpa [#allocation4], 1 }

</bundles_post_ra>
